<compile_context>
chip_gen: v6e
topology: v6e:2x2x1
jax: 0.10.0
libtpu: 0.0.40
codegen_flags: <defaults>
</compile_context>

<pallas_src>
import jax
import jax.numpy as jnp
from jax.experimental import pallas as pl
from jax.experimental.pallas import tpu as pltpu


_LANES = 128
_MAX_LANE_WIDTH = 2048          # widest lane-dense last dim to consider
# 2 MiB block: (in + out) * double-buffering = 8 MiB resident VMEM, safe on
# v5e/v6e/v7x default scoped limits; ~85% of HBM roofline measured on v6e.
_TARGET_BLOCK_BYTES = 2 * 1024 * 1024


def _copy_kernel(x_ref, o_ref):
    # Straight identity copy of the current (block_rows, C) tile.
    o_ref[...] = x_ref[...]


def _min_sublanes(dtype):
    """Native sublane packing for this dtype: 8 (4B), 16 (2B), 32 (1B)."""
    itemsize = jnp.dtype(dtype).itemsize
    return max(8, 32 // max(itemsize, 1))


def _pallas_copy_2d(x2d):
    """Tiled identity copy of a (R, C) array through VMEM.

    C must be a multiple of 128, unless the whole array fits in one block
    (block_shape == full array dims is always legal).
    """
    R, C = x2d.shape
    itemsize = jnp.dtype(x2d.dtype).itemsize
    sub = _min_sublanes(x2d.dtype)

    target_rows = max(1, _TARGET_BLOCK_BYTES // (C * itemsize))
    if R <= target_rows:
        block_rows = R                                   # full row extent
    else:
        block_rows = max(sub, (target_rows // sub) * sub)  # dtype-aware rows
    grid = (pl.cdiv(R, block_rows),)

    return pl.pallas_call(
        _copy_kernel,
        out_shape=jax.ShapeDtypeStruct((R, C), x2d.dtype),
        grid_spec=pltpu.PrefetchScalarGridSpec(
            num_scalar_prefetch=0,
            grid=grid,
            in_specs=[pl.BlockSpec((block_rows, C), lambda i: (i, 0))],
            out_specs=pl.BlockSpec((block_rows, C), lambda i: (i, 0)),
        ),
        compiler_params=pltpu.CompilerParams(
            dimension_semantics=("parallel",),           # shards over v7x's 2 TCs
        ),
    )(x2d)


def _resolve_size(size, total):
    """torch.view-style size resolution (single -1, divisibility enforced)."""
    size = tuple(int(s) for s in size)
    if sum(1 for s in size if s == -1) > 1:
        raise ValueError("only one dimension can be inferred (-1)")
    if -1 in size:
        known = 1
        for s in size:
            if s != -1:
                known *= s
        if known == 0 or total % known != 0:
            raise ValueError(f"cannot view {total} elements as {size}")
        size = tuple(total // known if s == -1 else s for s in size)
    prod = 1
    for s in size:
        prod *= s
    if prod != total:
        raise ValueError(f"view size {size} incompatible with {total} elements")
    return size


def view(x, size):
    """Pallas-backed equivalent of torch.Tensor.view(size)."""
    total = int(x.size)
    size = _resolve_size(size, total)

    # Pick the widest lane-dense factorization (R, C), C a multiple of 128,
    # that divides the flat stream exactly -> zero padding / trimming copies.
    C = 0
    for cand in (_MAX_LANE_WIDTH, 1024, 512, 256, _LANES):
        if total % cand == 0:
            C = cand
            break

    if C:
        x2d = x.reshape(total // C, C)          # metadata-only (contiguous)
        y2d = _pallas_copy_2d(x2d)
        return y2d.reshape(size)                # metadata-only
    if total * jnp.dtype(x.dtype).itemsize <= _TARGET_BLOCK_BYTES:
        # Ragged small tensor: single full-extent block (compiler pads in VMEM).
        y2d = _pallas_copy_2d(x.reshape(1, total))
        return y2d.reshape(size)
    # Ragged huge tensor (total not a multiple of 128): a contiguous view is
    # metadata-only anyway; a copy kernel would only add HBM traffic.
    # TODO(synk): ragged (total % 128 != 0) large tensors bypass the copy kernel.
    return jnp.reshape(x, size)


if __name__ == "__main__":
    key = jax.random.PRNGKey(0)
    # NCHW activations being flattened, e.g. View((2, 1024)) on (2, 4, 16, 16).
    x = jax.random.normal(key, (2, 4, 16, 16), dtype=jnp.float32)

    # Explicit target size.
    y = jax.block_until_ready(view(x, (2, 1024)))
    ref = x.reshape(2, 1024)
    assert y.shape == ref.shape and y.dtype == ref.dtype
    assert bool(jnp.array_equal(y, ref))

    # -1 inference, like View((-1, 256)).
    y2 = jax.block_until_ready(view(x, (-1, 256)))
    ref2 = x.reshape(-1, 256)
    assert y2.shape == ref2.shape
    assert bool(jnp.array_equal(y2, ref2))

    # Narrow dtype path (bf16) exercises the dtype-aware sublane sizing.
    xb = x.astype(jnp.bfloat16)
    y3 = jax.block_until_ready(view(xb, (8, 256)))
    assert y3.dtype == jnp.bfloat16 and y3.shape == (8, 256)
    assert bool(jnp.array_equal(y3, xb.reshape(8, 256)))

    print("KERNEL_OK")
</pallas_src>

<mosaic_0001>
module attributes {stable_mosaic.version = 11 : i64} {
  func.func @_copy_kernel(%arg0: i32, %arg1: memref<1x2048xf32, #tpu.memory_space<vmem>>, %arg2: memref<1x2048xf32, #tpu.memory_space<vmem>>) attributes {dimension_semantics = [#tpu.dimension_semantics<parallel>], iteration_bounds = array<i64: 1>, scalar_prefetch = 0 : i64, scratch_operands = 0 : i64, tpu.core_type = #tpu.core_type<tc>, window_params = [{transform_indices = @transform_0, window_bounds = array<i64: 1, 2048>}, {transform_indices = @transform_1, window_bounds = array<i64: 1, 2048>}]} {
    %c0 = arith.constant 0 : index
    %c0_0 = arith.constant 0 : index
    %0 = vector.load %arg1[%c0, %c0_0] : memref<1x2048xf32, #tpu.memory_space<vmem>>, vector<1x2048xf32>
    %c0_1 = arith.constant 0 : index
    %c0_2 = arith.constant 0 : index
    %1 = vector.load %arg2[%c0_1, %c0_2] : memref<1x2048xf32, #tpu.memory_space<vmem>>, vector<1x2048xf32>
    tpu.vector_store %arg2[%c0_1, %c0_2], %0 {strides = array<i32>} : memref<1x2048xf32, #tpu.memory_space<vmem>>, vector<1x2048xf32>,
    return
  }
  func.func @transform_0(%arg0: i32) -> (i32, i32) {
    %c0_i32 = arith.constant 0 : i32
    %c0_i32_0 = arith.constant 0 : i32
    return %arg0, %c0_i32 : i32, i32
  }
  func.func @transform_1(%arg0: i32) -> (i32, i32) {
    %c0_i32 = arith.constant 0 : i32
    %c0_i32_0 = arith.constant 0 : i32
    return %arg0, %c0_i32 : i32, i32
  }
}

</mosaic_0001>

<bundles_post_ra>
// kernel: tpu_custom_call.1
= control target key start
LH: loop header
LB: loop body
LE: loop exit
PB: predicated region body
PF: predicated region fallthrough
CT: control target
= control target key end

     0   :  { %6 = vsyncpa [#allocation3], 0  ;;  %s104_s0 = inlined_call_operand.hbm [shape: f32[1,2048], index: 0, kind: input, shape index: {}]   ;;  %s105_s1 = inlined_call_operand.hbm [shape: f32[1,2048], index: 1, kind: output, shape index: {}]  }
   0x1   :  { %7 = vsyncpa [#allocation4], 0  ;;  %s86_s6 = smov [#allocation2]  }
   0x2   :  { %s14_s7 = sshll.u32 %s86_s6, 4  ;;  %s15_s7 = int_to_ptr.vmem [resolvable:$true] %s14_s7 }
   0x3   :  { %s50_s8 = scalar_lea.vmem %s15_s7, 256  ;;  %p55_p1 = scmp.lt.s32.totalorder %s15_s7, %s15_s7 }
   0x4   :  { %p51_p0 = scmp.ne.s32.totalorder %s15_s7, %s50_s8  ;;  %p56_p2 = scmp.lt.s32.totalorder %s50_s8, %s50_s8 }
   0x6   :  { %p57_p3 = por %p56_p2, %p55_p1 }
   0x8   :  { %p58_p4 = pnand %p57_p3, %p51_p0 }
   0xa   :  { %61 = shalt.err (!%p58_p4)
}
   0xb   :  { %17 = dma.hbm_to_vmem [thread:$0]  %s104_s0, 256, %s15_s7, [#allocation3]  }
   0xc   :  { %82 = dma.done.wait [#allocation3], 256  }
   0xd   :  { %83 = vsyncadd [#allocation3], 4294967040  ;;  %s87_s11 = smov [#allocation5]   ;;  %v21_v0 = vld [vmem:[#allocation2] sm:$0xff]  ;;  %v22_v1 = vld [vmem:[#allocation2 + $0x8] sm:$0xff] }
   0xe   :  { %s31_s12 = sshll.u32 %s87_s11, 4  ;;  %23 = vst [vmem:[#allocation5] sm:$0xff] %v21_v0  ;;  %24 = vst [vmem:[#allocation5 + $0x8] sm:$0xff] %v22_v1  ;;  %s32_s12 = int_to_ptr.vmem [resolvable:$true] %s31_s12 }
   0xf   :  { %s62_s13 = scalar_lea.vmem %s32_s12, 256  ;;  %p67_p6 = scmp.lt.s32.totalorder %s32_s12, %s32_s12 }
  0x10   :  { %p63_p5 = scmp.ne.s32.totalorder %s32_s12, %s62_s13  ;;  %p68_p7 = scmp.lt.s32.totalorder %s62_s13, %s62_s13 }
  0x12   :  { %p69_p8 = por %p68_p7, %p67_p6 }
  0x14   :  { %p70_p9 = pnand %p69_p8, %p63_p5 }
  0x16   :  { %73 = shalt.err (!%p70_p9)
}
  0x17   :  { %34 = dma.vmem_to_hbm [thread:$0]  %s32_s12, 256, %s105_s1, [#allocation4]  }
  0x18   :  { %84 = dma.done.wait [#allocation4], 256  }
  0x19   :  { %85 = vsyncadd [#allocation4], 4294967040 }
  0x1a   :  { %38 = vsyncpa [#allocation3], 1 }
  0x1b   :  { %39 = vsyncpa [#allocation4], 1 }

</bundles_post_ra>
